<compile_context>
chip_gen: v7x
topology: tpu7x:2x2x1
jax: 0.10.0
libtpu: 0.0.40
codegen_flags: <defaults>
</compile_context>

<pallas_src>
import functools
import math

import jax
import jax.numpy as jnp
from jax.experimental import pallas as pl
from jax.experimental.pallas import tpu as pltpu


def _round_up(x, m):
    return (x + m - 1) // m * m


def bert_output_kernel(x_ref, res_ref, wt_ref, b_ref, g_ref, beta_ref, o_ref, *, eps):
    # Dense projection: (TB, I) @ (I, H) -> (TB, H), f32 accumulation on the MXU.
    dense = jnp.dot(x_ref[...], wt_ref[...], preferred_element_type=jnp.float32)
    # Bias + residual in f32 (VPU fast path on all generations).
    y = dense + b_ref[...] + res_ref[...].astype(jnp.float32)
    # LayerNorm over the hidden (lane) axis.
    mean = jnp.mean(y, axis=-1, keepdims=True)
    centered = y - mean
    var = jnp.mean(centered * centered, axis=-1, keepdims=True)
    inv = jax.lax.rsqrt(var + eps)
    out = centered * inv * g_ref[...] + beta_ref[...]
    o_ref[...] = out.astype(o_ref.dtype)


def meta_bert_output_forward(hidden_states, input_tensor, w_dense, b_dense,
                             ln_weight, ln_bias, *, eps=1e-12, block_rows=512):
    """hidden_states: (..., I); input_tensor: (..., H);
    w_dense: (H, I) PyTorch layout; b_dense/ln_weight/ln_bias: (H,)."""
    orig_shape = input_tensor.shape
    H, I = w_dense.shape

    x2 = hidden_states.reshape(-1, I)
    r2 = input_tensor.reshape(-1, H)
    rows = x2.shape[0]

    # Row tile: sublane-aligned; pad rows so every block is full (no partial
    # blocks on the row axis).
    tb = min(block_rows, _round_up(rows, 8))
    rows_p = _round_up(rows, tb)
    if rows_p != rows:
        x2 = jnp.pad(x2, ((0, rows_p - rows), (0, 0)))
        r2 = jnp.pad(r2, ((0, rows_p - rows), (0, 0)))

    # Pre-transpose the weight in the wrapper (kills in-kernel XLU transposes).
    w_t = jnp.asarray(w_dense).T            # (I, H)
    b2 = b_dense.reshape(1, H)
    g2 = ln_weight.reshape(1, H)
    beta2 = ln_bias.reshape(1, H)

    grid = (rows_p // tb,)
    x_spec = pl.BlockSpec((tb, I), lambda i: (i, 0))
    res_spec = pl.BlockSpec((tb, H), lambda i: (i, 0))
    const2 = lambda shape: pl.BlockSpec(shape, lambda i: (0, 0))  # VMEM-resident
    out_spec = pl.BlockSpec((tb, H), lambda i: (i, 0))

    itemsize = x2.dtype.itemsize
    bytes_accessed = (x2.size * itemsize + r2.size * r2.dtype.itemsize
                      + w_t.size * w_t.dtype.itemsize
                      + (b2.size + g2.size + beta2.size) * 4
                      + rows_p * H * itemsize)
    cost = pl.CostEstimate(flops=2 * rows_p * I * H + 10 * rows_p * H,
                           transcendentals=rows_p,
                           bytes_accessed=int(bytes_accessed))

    # VMEM budget: resident weight/params + double-buffered row tiles (+headroom).
    vmem_need = (w_t.size * w_t.dtype.itemsize + 3 * H * 4
                 + 2 * tb * I * itemsize          # x, double-buffered
                 + 2 * tb * H * itemsize          # residual, double-buffered
                 + 2 * tb * H * itemsize)         # out, double-buffered
    vmem_limit = int(min(max(2 * vmem_need, 16 << 20), 48 << 20))

    out = pl.pallas_call(
        functools.partial(bert_output_kernel, eps=eps),
        out_shape=jax.ShapeDtypeStruct((rows_p, H), hidden_states.dtype),
        grid=grid,
        in_specs=[x_spec, res_spec, const2((I, H)),
                  const2((1, H)), const2((1, H)), const2((1, H))],
        out_specs=out_spec,
        compiler_params=pltpu.CompilerParams(
            dimension_semantics=("parallel",),
            vmem_limit_bytes=vmem_limit),
        cost_estimate=cost,
    )(x2, r2, w_t, b2, g2, beta2)

    if rows_p != rows:
        out = out[:rows]
    return out.reshape(orig_shape)


def xavier_uniform(key, out_f, in_f, dtype=jnp.float32):
    bound = math.sqrt(6.0 / (in_f + out_f))
    return jax.random.uniform(key, (out_f, in_f), dtype=dtype,
                              minval=-bound, maxval=bound)


if __name__ == "__main__":
    # Small config consistent with the module: hidden_size=32, intermediate_size=64.
    hidden_size = 32
    intermediate_size = 64
    batch, seq = 2, 8
    eps = 1e-12  # config.layer_norm_eps (BERT default)

    key = jax.random.PRNGKey(0)
    k_hs, k_res, k_w, k_g, k_b = jax.random.split(key, 5)

    hidden_states = jax.random.normal(k_hs, (batch, seq, intermediate_size),
                                      dtype=jnp.float32)
    input_tensor = jax.random.normal(k_res, (batch, seq, hidden_size),
                                     dtype=jnp.float32)

    # MetaLinearLayer init: xavier_uniform weight, zero bias.
    w_dense = xavier_uniform(k_w, hidden_size, intermediate_size)
    b_dense = jnp.zeros((hidden_size,), jnp.float32)
    # MetaLayerNormLayer defaults to gamma=1, beta=0; perturb them here so the
    # affine path is actually exercised numerically.
    ln_weight = 1.0 + 0.1 * jax.random.normal(k_g, (hidden_size,), dtype=jnp.float32)
    ln_bias = 0.1 * jax.random.normal(k_b, (hidden_size,), dtype=jnp.float32)

    out = meta_bert_output_forward(hidden_states, input_tensor, w_dense, b_dense,
                                   ln_weight, ln_bias, eps=eps)
    out = jax.block_until_ready(out)

    # Pure-JAX reference: F.linear -> +residual -> F.layer_norm (eval: no dropout).
    dense = hidden_states @ w_dense.T + b_dense
    y = dense + input_tensor
    mean = y.mean(-1, keepdims=True)
    var = ((y - mean) ** 2).mean(-1, keepdims=True)
    ref = (y - mean) / jnp.sqrt(var + eps) * ln_weight + ln_bias

    assert out.shape == input_tensor.shape
    assert jnp.allclose(out, ref, atol=1e-5, rtol=1e-5), \
        float(jnp.max(jnp.abs(out - ref)))

    print("KERNEL_OK")
</pallas_src>

<mosaic_0001>
module attributes {stable_mosaic.version = 11 : i64} {
  func.func @bert_output_kernel(%arg0: i32, %arg1: memref<16x64xf32, #tpu.memory_space<vmem>>, %arg2: memref<16x32xf32, #tpu.memory_space<vmem>>, %arg3: memref<64x32xf32, #tpu.memory_space<vmem>>, %arg4: memref<1x32xf32, #tpu.memory_space<vmem>>, %arg5: memref<1x32xf32, #tpu.memory_space<vmem>>, %arg6: memref<1x32xf32, #tpu.memory_space<vmem>>, %arg7: memref<16x32xf32, #tpu.memory_space<vmem>>) attributes {dimension_semantics = [#tpu.dimension_semantics<parallel>], iteration_bounds = array<i64: 1>, scalar_prefetch = 0 : i64, scratch_operands = 0 : i64, tpu.core_type = #tpu.core_type<tc>, window_params = [{transform_indices = @transform_0, window_bounds = array<i64: 16, 64>}, {transform_indices = @transform_1, window_bounds = array<i64: 16, 32>}, {pipeline_mode = #tpu.pipeline_mode<synchronous>, transform_indices = @transform_2, window_bounds = array<i64: 64, 32>}, {pipeline_mode = #tpu.pipeline_mode<synchronous>, transform_indices = @transform_3, window_bounds = array<i64: 1, 32>}, {pipeline_mode = #tpu.pipeline_mode<synchronous>, transform_indices = @transform_4, window_bounds = array<i64: 1, 32>}, {pipeline_mode = #tpu.pipeline_mode<synchronous>, transform_indices = @transform_5, window_bounds = array<i64: 1, 32>}, {transform_indices = @transform_6, window_bounds = array<i64: 16, 32>}]} {
    %c0 = arith.constant 0 : index
    %c0_0 = arith.constant 0 : index
    %0 = vector.load %arg1[%c0, %c0_0] : memref<16x64xf32, #tpu.memory_space<vmem>>, vector<16x64xf32>
    %c0_1 = arith.constant 0 : index
    %c0_2 = arith.constant 0 : index
    %1 = vector.load %arg3[%c0_1, %c0_2] : memref<64x32xf32, #tpu.memory_space<vmem>>, vector<64x32xf32>
    %cst = arith.constant dense<0.000000e+00> : vector<16x32xf32>
    %2 = tpu.matmul %0, %1, %cst {dimension_numbers = #tpu.dot_dimension_numbers<[1], [0], [0], [1], [0, 0, 1, 1], [], []>} : vector<16x64xf32>, vector<64x32xf32>, vector<16x32xf32> -> vector<16x32xf32>
    %c0_3 = arith.constant 0 : index
    %c0_4 = arith.constant 0 : index
    %3 = vector.load %arg4[%c0_3, %c0_4] : memref<1x32xf32, #tpu.memory_space<vmem>>, vector<1x32xf32>
    %4 = vector.broadcast %3 : vector<1x32xf32> to vector<16x32xf32>
    %5 = arith.addf %2, %4 : vector<16x32xf32>
    %c0_5 = arith.constant 0 : index
    %c0_6 = arith.constant 0 : index
    %6 = vector.load %arg2[%c0_5, %c0_6] : memref<16x32xf32, #tpu.memory_space<vmem>>, vector<16x32xf32>
    %7 = arith.addf %5, %6 : vector<16x32xf32>
    %cst_7 = arith.constant dense<0.000000e+00> : vector<16xf32>
    %8 = vector.multi_reduction <add>, %7, %cst_7 [1] : vector<16x32xf32> to vector<16xf32>
    %9 = vector.shape_cast %8 : vector<16xf32> to vector<16x1xf32>
    %cst_8 = arith.constant 3.200000e+01 : f32
    %10 = vector.broadcast %cst_8 : f32 to vector<16x1xf32>
    %11 = arith.divf %9, %10 : vector<16x1xf32>
    %12 = vector.broadcast %11 : vector<16x1xf32> to vector<16x32xf32>
    %13 = arith.subf %7, %12 : vector<16x32xf32>
    %14 = arith.mulf %13, %13 : vector<16x32xf32>
    %cst_9 = arith.constant dense<0.000000e+00> : vector<16xf32>
    %15 = vector.multi_reduction <add>, %14, %cst_9 [1] : vector<16x32xf32> to vector<16xf32>
    %16 = vector.shape_cast %15 : vector<16xf32> to vector<16x1xf32>
    %cst_10 = arith.constant 3.200000e+01 : f32
    %17 = vector.broadcast %cst_10 : f32 to vector<16x1xf32>
    %18 = arith.divf %16, %17 : vector<16x1xf32>
    %cst_11 = arith.constant 9.99999996E-13 : f32
    %19 = vector.broadcast %cst_11 : f32 to vector<16x1xf32>
    %20 = arith.addf %18, %19 : vector<16x1xf32>
    %21 = math.rsqrt %20 : vector<16x1xf32>
    %22 = vector.broadcast %21 : vector<16x1xf32> to vector<16x32xf32>
    %23 = arith.mulf %13, %22 : vector<16x32xf32>
    %c0_12 = arith.constant 0 : index
    %c0_13 = arith.constant 0 : index
    %24 = vector.load %arg5[%c0_12, %c0_13] : memref<1x32xf32, #tpu.memory_space<vmem>>, vector<1x32xf32>
    %25 = vector.broadcast %24 : vector<1x32xf32> to vector<16x32xf32>
    %26 = arith.mulf %23, %25 : vector<16x32xf32>
    %c0_14 = arith.constant 0 : index
    %c0_15 = arith.constant 0 : index
    %27 = vector.load %arg6[%c0_14, %c0_15] : memref<1x32xf32, #tpu.memory_space<vmem>>, vector<1x32xf32>
    %28 = vector.broadcast %27 : vector<1x32xf32> to vector<16x32xf32>
    %29 = arith.addf %26, %28 : vector<16x32xf32>
    %c0_16 = arith.constant 0 : index
    %c0_17 = arith.constant 0 : index
    %30 = vector.load %arg7[%c0_16, %c0_17] : memref<16x32xf32, #tpu.memory_space<vmem>>, vector<16x32xf32>
    tpu.vector_store %arg7[%c0_16, %c0_17], %29 {strides = array<i32>} : memref<16x32xf32, #tpu.memory_space<vmem>>, vector<16x32xf32>,
    return
  }
  func.func @transform_0(%arg0: i32) -> (i32, i32) {
    %c0_i32 = arith.constant 0 : i32
    %c0_i32_0 = arith.constant 0 : i32
    return %arg0, %c0_i32 : i32, i32
  }
  func.func @transform_1(%arg0: i32) -> (i32, i32) {
    %c0_i32 = arith.constant 0 : i32
    %c0_i32_0 = arith.constant 0 : i32
    return %arg0, %c0_i32 : i32, i32
  }
  func.func @transform_2(%arg0: i32) -> (i32, i32) {
    %c0_i32 = arith.constant 0 : i32
    %c0_i32_0 = arith.constant 0 : i32
    %c0_i32_1 = arith.constant 0 : i32
    return %c0_i32, %c0_i32_0 : i32, i32
  }
  func.func @transform_3(%arg0: i32) -> (i32, i32) {
    %c0_i32 = arith.constant 0 : i32
    %c0_i32_0 = arith.constant 0 : i32
    %c0_i32_1 = arith.constant 0 : i32
    return %c0_i32, %c0_i32_0 : i32, i32
  }
  func.func @transform_4(%arg0: i32) -> (i32, i32) {
    %c0_i32 = arith.constant 0 : i32
    %c0_i32_0 = arith.constant 0 : i32
    %c0_i32_1 = arith.constant 0 : i32
    return %c0_i32, %c0_i32_0 : i32, i32
  }
  func.func @transform_5(%arg0: i32) -> (i32, i32) {
    %c0_i32 = arith.constant 0 : i32
    %c0_i32_0 = arith.constant 0 : i32
    %c0_i32_1 = arith.constant 0 : i32
    return %c0_i32, %c0_i32_0 : i32, i32
  }
  func.func @transform_6(%arg0: i32) -> (i32, i32) {
    %c0_i32 = arith.constant 0 : i32
    %c0_i32_0 = arith.constant 0 : i32
    return %arg0, %c0_i32 : i32, i32
  }
}

</mosaic_0001>

<bundles_post_ra>
// kernel: tpu_custom_call.1
= control target key start
LH: loop header
LB: loop body
LE: loop exit
PB: predicated region body
PF: predicated region fallthrough
CT: control target
= control target key end

     0   :  { %vm41_vm0 = vcmask 523264   ;;  %s375_s0 = inlined_call_operand.vmem [shape: f32[16,64], index: 0, kind: input, shape index: {}]   ;;  %s376_s1 = inlined_call_operand.vmem [shape: f32[16,32], index: 1, kind: input, shape index: {}]   ;;  %s377_s2 = inlined_call_operand.vmem [shape: f32[64,32], index: 2, kind: input, shape index: {}]   ;;  %s378_s3 = inlined_call_operand.vmem [shape: f32[1,32], index: 3, kind: input, shape index: {}]   ;;  %s379_s4 = inlined_call_operand.vmem [shape: f32[1,32], index: 4, kind: input, shape index: {}]   ;;  %s380_s5 = inlined_call_operand.vmem [shape: f32[1,32], index: 5, kind: input, shape index: {}]   ;;  %s381_s6 = inlined_call_operand.hbm [shape: f32[16,32], index: 6, kind: output, shape index: {}]  }
   0x1   :  { %v26_v0 = vld [vmem:[%s377_s2] sm:$0xff]  ;;  %v27_v1 = vld [vmem:[%s377_s2 + $0x8] sm:$0xff]  ;;  %v28_v2 = vld [vmem:[%s377_s2 + $0x10] sm:$0xff] }
   0x2   :  { %v225_v3 = vpack.c.bf16 %v27_v1, %v26_v0  ;;  %v29_v4 = vld [vmem:[%s377_s2 + $0x18] sm:$0xff]  ;;  %v30_v6 = vld [vmem:[%s377_s2 + $0x20] sm:$0xff]  ;;  %v31_v7 = vld [vmem:[%s377_s2 + $0x28] sm:$0xff] }
   0x3   :  { %v229_v5 = vpack.c.bf16 %v29_v4, %v28_v2  ;;  %v24_v8 = vld [vmem:[%s375_s0] sm:$0xff] }
   0x4   :  { %226 = vmatprep.subr.bf16.mxu0 %v225_v3  ;;  %222 = vmatprep.mubr.msk.f32.mxu0 %vm41_vm0, %v24_v8 }
   0x5   :  { %11 = vsyncpa [#allocation3], 0  ;;  %228 = vmatpush3.bf16.msra.mxu0 %v225_v3  ;;  %v233_v9 = vpack.c.bf16 %v31_v7, %v30_v6  ;;  %v32_v10 = vld [vmem:[%s377_s2 + $0x30] sm:$0xff]  ;;  %v33_v11 = vld [vmem:[%s377_s2 + $0x38] sm:$0xff]  ;;  %vm127_vm1 = vcmask 261120   ;;  %s272_s23 = smov [#allocation2]  }
   0x6   :  { %230 = vmatprep.subr.bf16.mxu0 %v229_v5  ;;  %v237_v12 = vpack.c.bf16 %v33_v11, %v32_v10  ;;  %v25_v13 = vld [vmem:[%s375_s0 + $0x8] sm:$0xff]  ;;  %v191_v14 = vld [vmem:[%s378_s3] ss:$0 sm:$0xff]  ;;  %s180_s24 = sshll.u32 %s272_s23, 4  ;;  %s181_s24 = int_to_ptr.vmem [resolvable:$true] %s180_s24 }
   0x7   :  { %v123_v17 = vld [vmem:[%s376_s1] sm:$0xff]  ;;  %v124_v20 = vld [vmem:[%s376_s1 + $0x8] sm:$0xff]  ;;  %s248_s25 = scalar_lea.vmem %s181_s24, 256  ;;  %p253_p1 = scmp.lt.s32.totalorder %s181_s24, %s181_s24 }
   0x8   :  { %v194_v42 = vld [vmem:[%s379_s4] ss:$0 sm:$0xff]  ;;  %p249_p0 = scmp.ne.s32.totalorder %s181_s24, %s248_s25  ;;  %p254_p2 = scmp.lt.s32.totalorder %s248_s25, %s248_s25 }
   0x9   :  { %232 = vmatpush3.bf16.msra.mxu0 %v229_v5  ;;  %v195_v44 = vld [vmem:[%s380_s5] ss:$0 sm:$0xff] }
   0xa   :  { %234 = vmatprep.subr.bf16.mxu0 %v233_v9  ;;  %p255_p3 = por %p254_p2, %p253_p1 }
   0xc   :  { %p256_p4 = pnand %p255_p3, %p249_p0 }
   0xd   :  { %236 = vmatpush3.bf16.msra.mxu0 %v233_v9 }
   0xe   :  { %238 = vmatprep.subr.bf16.mxu0 %v237_v12 }
  0x11   :  { %240 = vmatpush3.bf16.msra.mxu0 %v237_v12 }
  0x14   :  { %223 = vmatmul.mubr.msk.f32.vlgmr.msra.gmra.mrb[0].mxu0 %vm41_vm0, %v25_v13 }
  0xe7   :  { %v224_v15 = vpop.f32.mrb[0].mxu0 }
  0xe8   :  { %v114_v16 = vpop.f32.mrb[1].mxu0  ;;  %v120_v18 = vadd.f32 %v224_v15, %v191_v14 }
  0xe9   :  { %v115_v19 = vadd.f32 %v191_v14, %v114_v16 }
  0xea   :  { %v126_v23 = vadd.f32 %v124_v20, %v120_v18 }
  0xeb   :  { %v125_v21 = vadd.f32 %v123_v17, %v115_v19 }
  0xec   :  { %v131_v24 = vsel %vm127_vm1, %v126_v23, 0.0 }
  0xed   :  { %v128_v22 = vsel %vm127_vm1, %v125_v21, 0.0 }
  0xee   :  { %129 = vadd.xlane.f32.xlu0 %v128_v22 }
  0xf2   :  { %132 = vadd.xlane.f32.xlu0 %v131_v24 }
 0x17b   :  { %v130_v25 = vpop.xlane.xlu0 %129 }
 0x17c   :  { %v135_v26 = vmul.f32 0.03125, %v130_v25 }
 0x17e   :  { %v137_v27 = vsub.f32 %v125_v21, %v135_v26 }
 0x17f   :  { %v133_v28 = vpop.xlane.xlu0 %132 }
 0x180   :  { %v136_v29 = vmul.f32 0.03125, %v133_v28  ;;  %v139_v30 = vmul.f32 %v137_v27, %v137_v27 }
 0x182   :  { %v138_v31 = vsub.f32 %v126_v23, %v136_v29  ;;  %v141_v32 = vsel %vm127_vm1, %v139_v30, 0.0 }
 0x183   :  { %142 = vadd.xlane.f32.xlu1 %v141_v32 }
 0x184   :  { %v140_v33 = vmul.f32 %v138_v31, %v138_v31 }
 0x186   :  { %v144_v34 = vsel %vm127_vm1, %v140_v33, 0.0 }
 0x187   :  { %145 = vadd.xlane.f32.xlu1 %v144_v34 }
 0x210   :  { %v143_v35 = vpop.xlane.xlu1 %142 }
 0x211   :  { %v147_v36 = vmul.f32 0.03125, %v143_v35 }
 0x213   :  { %v149_v37 = vadd.f32 1e-12, %v147_v36 }
 0x214   :  { %v146_v38 = vpop.xlane.xlu1 %145 }
 0x215   :  { %244 = vrsqrt.f32 %v149_v37  ;;  %v148_v39 = vmul.f32 0.03125, %v146_v38 }
 0x217   :  { %v150_v40 = vadd.f32 1e-12, %v148_v39 }
 0x219   :  { %246 = vrsqrt.f32 %v150_v40 }
 0x21f   :  { %v245_v41 = vpop.eup %244 }
 0x220   :  { %v153_v43 = vmul.f32 %v245_v41, %v137_v27 }
 0x222   :  { %v162_v45 = vmul.f32 %v194_v42, %v153_v43 }
 0x223   :  { %v247_v46 = vpop.eup %246 }
 0x224   :  { %v154_v47 = vmul.f32 %v247_v46, %v138_v31  ;;  %v171_v48 = vadd.f32 %v195_v44, %v162_v45 }
 0x226   :  { %v163_v49 = vmul.f32 %v194_v42, %v154_v47  ;;  %173 = vst.msk [vmem:[#allocation2] sm:$0xff] %vm127_vm1, %v171_v48 }
 0x228   :  { %v172_v50 = vadd.f32 %v195_v44, %v163_v49 }
 0x22a   :  { %174 = vst.msk [vmem:[#allocation2 + $0x8] sm:$0xff] %vm127_vm1, %v172_v50 }
 0x22b   :  { %259 = shalt.err (!%p256_p4)
}
 0x22c   :  { %s260_s26 = scalar_lea.hbm %s381_s6, 256 }
 0x22d   :  { %p261_p5 = scmp.ne.s32.totalorder %s381_s6, %s260_s26  ;;  %p264_p6 = scmp.lt.u32.totalorder %s260_s26, %s381_s6 }
 0x22f   :  { %p266_p7 = pnand %p264_p6, %p261_p5 }
 0x231   :  { %269 = shalt.err (!%p266_p7)
}
 0x232   :  { %s273_s7 = smov 128   ;;  %s274_s8 = smov 8  }
 0x233   :  { %186 = dma.vmem_to_hbm [thread:$0]  %s181_s24, 256, %s381_s6, [#allocation3], %s273_s7, %s273_s7, %s274_s8  }
 0x234   :  { %270 = dma.done.wait [#allocation3], 256  }
 0x235   :  { %271 = vsyncadd [#allocation3], 4294967040 }
 0x236   :  { %190 = vsyncpa [#allocation3], 1 }

</bundles_post_ra>
